<compile_context>
chip_gen: v5e
topology: v5e:2x2
jax: 0.10.0
libtpu: 0.0.40
codegen_flags: <defaults>
</compile_context>

<pallas_src>
import math

import jax
import jax.numpy as jnp
from jax.experimental import pallas as pl
from jax.experimental.pallas import tpu as pltpu

EPS = 1e-12


def _layernorm_kernel(x_ref, g_ref, b_ref, o_ref):
    # Load tile and do all math in f32.
    x = x_ref[...].astype(jnp.float32)

    u = jnp.mean(x, axis=-1, keepdims=True)          # XLU reduce #1
    d = x - u
    s = jnp.mean(d * d, axis=-1, keepdims=True)      # XLU reduce #2 (reuses d)

    # rsqrt -> EUP slot; normalization becomes a VPU multiply.
    xn = d * jax.lax.rsqrt(s + EPS)

    y = g_ref[...].astype(jnp.float32) * xn + b_ref[...].astype(jnp.float32)
    o_ref[...] = y.astype(o_ref.dtype)


def layernorm_forward(x, gamma, beta, *, block_rows=512):
    """LayerNorm over the last dim of `x`.

    x: (..., H); gamma, beta: (H,).  Returns same shape/dtype as x.
    block_rows: row-tile size (lower it, e.g. 256, for very large H on v7x).
    """
    orig_shape = x.shape
    H = orig_shape[-1]
    M = math.prod(orig_shape[:-1]) if len(orig_shape) > 1 else 1

    x2 = x.reshape(M, H)
    g2 = gamma.reshape(1, H)
    b2 = beta.reshape(1, H)

    # Row tile: multiple of 8 sublanes, no larger than needed.
    tm = min(block_rows, M)
    tm = max(8, ((tm + 7) // 8) * 8)
    m_pad = pl.cdiv(M, tm) * tm
    if m_pad != M:
        x2 = jnp.pad(x2, ((0, m_pad - M), (0, 0)))

    itemsize = jnp.dtype(x.dtype).itemsize
    # Double-buffered input + output tiles; raise the scoped VMEM limit only
    # if the default 32 MiB would cap the pipeline (keep <= 64 MiB for v7x).
    est_vmem = 4 * tm * H * itemsize + (2 << 20)
    vmem_limit = min(est_vmem + (8 << 20), 64 << 20) if est_vmem > (32 << 20) else None

    cost = pl.CostEstimate(
        flops=8 * M * H,
        transcendentals=M,
        bytes_accessed=2 * M * H * itemsize + 2 * H * jnp.dtype(gamma.dtype).itemsize,
    )

    out = pl.pallas_call(
        _layernorm_kernel,
        out_shape=jax.ShapeDtypeStruct((m_pad, H), x.dtype),
        grid_spec=pltpu.PrefetchScalarGridSpec(
            num_scalar_prefetch=0,
            grid=(m_pad // tm,),
            in_specs=[
                pl.BlockSpec((tm, H), lambda i: (i, 0)),   # streamed rows
                pl.BlockSpec((1, H), lambda i: (0, 0)),    # gamma (resident)
                pl.BlockSpec((1, H), lambda i: (0, 0)),    # beta  (resident)
            ],
            out_specs=pl.BlockSpec((tm, H), lambda i: (i, 0)),
        ),
        compiler_params=pltpu.CompilerParams(
            dimension_semantics=("parallel",),
            vmem_limit_bytes=vmem_limit,
        ),
        cost_estimate=cost,
    )(x2, g2, b2)

    return out[:M].reshape(orig_shape)


def reference_layernorm(x, gamma, beta):
    u = jnp.mean(x, axis=-1, keepdims=True)
    s = jnp.mean((x - u) ** 2, axis=-1, keepdims=True)
    xn = (x - u) / jnp.sqrt(s + EPS)
    return gamma * xn + beta


if __name__ == "__main__":
    # Small shapes consistent with the module's forward (rows x hidden).
    # H is chosen as a multiple of 128 for lane-dense stores.
    B, S, hidden_size = 2, 8, 256

    key = jax.random.PRNGKey(0)
    k1, k2, k3 = jax.random.split(key, 3)

    x = jax.random.normal(k1, (B, S, hidden_size), jnp.float32) * 2.0 + 0.5
    # torch init is gamma=ones, beta=zeros; perturb them so the affine part
    # is actually exercised.
    gamma = jnp.ones((hidden_size,), jnp.float32) + 0.1 * jax.random.normal(
        k2, (hidden_size,), jnp.float32
    )
    beta = 0.1 * jax.random.normal(k3, (hidden_size,), jnp.float32)

    out = layernorm_forward(x, gamma, beta)
    jax.block_until_ready(out)

    ref = reference_layernorm(x, gamma, beta)
    assert out.shape == x.shape
    assert jnp.allclose(out, ref, atol=1e-5, rtol=1e-5), "mismatch vs reference"

    print("KERNEL_OK")
</pallas_src>

<mosaic_0001>
module attributes {stable_mosaic.version = 11 : i64} {
  func.func @_layernorm_kernel(%arg0: i32, %arg1: memref<16x256xf32, #tpu.memory_space<vmem>>, %arg2: memref<1x256xf32, #tpu.memory_space<vmem>>, %arg3: memref<1x256xf32, #tpu.memory_space<vmem>>, %arg4: memref<16x256xf32, #tpu.memory_space<vmem>>) attributes {dimension_semantics = [#tpu.dimension_semantics<parallel>], iteration_bounds = array<i64: 1>, scalar_prefetch = 0 : i64, scratch_operands = 0 : i64, tpu.core_type = #tpu.core_type<tc>, window_params = [{transform_indices = @transform_0, window_bounds = array<i64: 16, 256>}, {pipeline_mode = #tpu.pipeline_mode<synchronous>, transform_indices = @transform_1, window_bounds = array<i64: 1, 256>}, {pipeline_mode = #tpu.pipeline_mode<synchronous>, transform_indices = @transform_2, window_bounds = array<i64: 1, 256>}, {transform_indices = @transform_3, window_bounds = array<i64: 16, 256>}]} {
    %c0 = arith.constant 0 : index
    %c0_0 = arith.constant 0 : index
    %0 = vector.load %arg1[%c0, %c0_0] : memref<16x256xf32, #tpu.memory_space<vmem>>, vector<16x256xf32>
    %cst = arith.constant dense<0.000000e+00> : vector<16xf32>
    %1 = vector.multi_reduction <add>, %0, %cst [1] : vector<16x256xf32> to vector<16xf32>
    %2 = vector.shape_cast %1 : vector<16xf32> to vector<16x1xf32>
    %cst_1 = arith.constant 2.560000e+02 : f32
    %3 = vector.broadcast %cst_1 : f32 to vector<16x1xf32>
    %4 = arith.divf %2, %3 : vector<16x1xf32>
    %5 = vector.broadcast %4 : vector<16x1xf32> to vector<16x256xf32>
    %6 = arith.subf %0, %5 : vector<16x256xf32>
    %7 = arith.mulf %6, %6 : vector<16x256xf32>
    %cst_2 = arith.constant dense<0.000000e+00> : vector<16xf32>
    %8 = vector.multi_reduction <add>, %7, %cst_2 [1] : vector<16x256xf32> to vector<16xf32>
    %9 = vector.shape_cast %8 : vector<16xf32> to vector<16x1xf32>
    %cst_3 = arith.constant 2.560000e+02 : f32
    %10 = vector.broadcast %cst_3 : f32 to vector<16x1xf32>
    %11 = arith.divf %9, %10 : vector<16x1xf32>
    %cst_4 = arith.constant 9.99999996E-13 : f32
    %12 = vector.broadcast %cst_4 : f32 to vector<16x1xf32>
    %13 = arith.addf %11, %12 : vector<16x1xf32>
    %14 = math.rsqrt %13 : vector<16x1xf32>
    %15 = vector.broadcast %14 : vector<16x1xf32> to vector<16x256xf32>
    %16 = arith.mulf %6, %15 : vector<16x256xf32>
    %c0_5 = arith.constant 0 : index
    %c0_6 = arith.constant 0 : index
    %17 = vector.load %arg2[%c0_5, %c0_6] : memref<1x256xf32, #tpu.memory_space<vmem>>, vector<1x256xf32>
    %18 = vector.broadcast %17 : vector<1x256xf32> to vector<16x256xf32>
    %19 = arith.mulf %18, %16 : vector<16x256xf32>
    %c0_7 = arith.constant 0 : index
    %c0_8 = arith.constant 0 : index
    %20 = vector.load %arg3[%c0_7, %c0_8] : memref<1x256xf32, #tpu.memory_space<vmem>>, vector<1x256xf32>
    %21 = vector.broadcast %20 : vector<1x256xf32> to vector<16x256xf32>
    %22 = arith.addf %19, %21 : vector<16x256xf32>
    %c0_9 = arith.constant 0 : index
    %c0_10 = arith.constant 0 : index
    %23 = vector.load %arg4[%c0_9, %c0_10] : memref<16x256xf32, #tpu.memory_space<vmem>>, vector<16x256xf32>
    tpu.vector_store %arg4[%c0_9, %c0_10], %22 {strides = array<i32>} : memref<16x256xf32, #tpu.memory_space<vmem>>, vector<16x256xf32>,
    return
  }
  func.func @transform_0(%arg0: i32) -> (i32, i32) {
    %c0_i32 = arith.constant 0 : i32
    %c0_i32_0 = arith.constant 0 : i32
    return %arg0, %c0_i32 : i32, i32
  }
  func.func @transform_1(%arg0: i32) -> (i32, i32) {
    %c0_i32 = arith.constant 0 : i32
    %c0_i32_0 = arith.constant 0 : i32
    %c0_i32_1 = arith.constant 0 : i32
    return %c0_i32, %c0_i32_0 : i32, i32
  }
  func.func @transform_2(%arg0: i32) -> (i32, i32) {
    %c0_i32 = arith.constant 0 : i32
    %c0_i32_0 = arith.constant 0 : i32
    %c0_i32_1 = arith.constant 0 : i32
    return %c0_i32, %c0_i32_0 : i32, i32
  }
  func.func @transform_3(%arg0: i32) -> (i32, i32) {
    %c0_i32 = arith.constant 0 : i32
    %c0_i32_0 = arith.constant 0 : i32
    return %arg0, %c0_i32 : i32, i32
  }
}

</mosaic_0001>

<bundles_post_ra>
// kernel: tpu_custom_call.1
= control target key start
LH: loop header
LB: loop body
LE: loop exit
PB: predicated region body
PF: predicated region fallthrough
CT: control target
= control target key end

     0   :  { %8 = vsyncpa [#allocation3], 0  ;;  %s323_s0 = inlined_call_operand.hbm [shape: f32[16,256], index: 0, kind: input, shape index: {}]   ;;  %s324_s1 = inlined_call_operand.hbm [shape: f32[1,256], index: 1, kind: input, shape index: {}]   ;;  %s325_s2 = inlined_call_operand.hbm [shape: f32[1,256], index: 2, kind: input, shape index: {}]   ;;  %s326_s3 = inlined_call_operand.hbm [shape: f32[16,256], index: 3, kind: output, shape index: {}]  }
   0x1   :  { %9 = vsyncpa [#allocation6], 0  ;;  %s29_s14 = sshll.u32 %s324_s1, 4  ;;  %s30_s14 = int_to_ptr.hbm [resolvable:$true] %s29_s14 }
   0x2   :  { %10 = vsyncpa [#allocation4], 0  ;;  %s278_s15 = smov [#allocation5]   ;;  %s15_s19 = sshll.u32 %s323_s0, 4  ;;  %s16_s19 = int_to_ptr.hbm [resolvable:$true] %s15_s19 }
   0x3   :  { %s31_s16 = sshll.u32 %s278_s15, 4  ;;  %s279_s20 = smov [#allocation2]   ;;  %s32_s16 = int_to_ptr.vmem [resolvable:$true] %s31_s16 }
   0x4   :  { %34 = dma.hbm_to_vmem [thread:$0]  %s30_s14, 32, %s32_s16, [#allocation6]  }
   0x5   :  { %s17_s21 = sshll.u32 %s279_s20, 4  ;;  %s280_s22 = smov 256   ;;  %s18_s21 = int_to_ptr.vmem [resolvable:$true] %s17_s21 }
   0x6   :  { %s281_s23 = smov 16   ;;  %s40_s25 = sshll.u32 %s325_s2, 4  ;;  %s41_s25 = int_to_ptr.hbm [resolvable:$true] %s40_s25 }
   0x7   :  { %23 = dma.hbm_to_vmem [thread:$0]  %s16_s19, 512, %s18_s21, [#allocation3], %s280_s22, %s280_s22, %s281_s23  }
   0x8   :  { %s282_s26 = smov [#allocation7]  }
   0x9   :  { %s42_s27 = sshll.u32 %s282_s26, 4  ;;  %s43_s27 = int_to_ptr.vmem [resolvable:$true] %s42_s27 }
   0xa   :  { %45 = dma.hbm_to_vmem [thread:$0]  %s41_s25, 32, %s43_s27, [#allocation6]  }
   0xb   :  { %272 = dma.done.wait [#allocation3], 512  }
   0xc   :  { %273 = vsyncadd [#allocation3], 4294966784 }
   0xd   :  { %274 = dma.done.wait [#allocation6], 64  }
   0xe   :  { %275 = vsyncadd [#allocation6], 4294967232  ;;  %v58_v0 = vld [vmem:[#allocation2] sm:$0xff]  ;;  %v59_v1 = vld [vmem:[#allocation2 + $0x8] sm:$0xff]  ;;  %v283_v6 = vmov 256.0   ;;  %s284_s0 = smov [#allocation8]  }
   0xf   :  { %v62_v2 = vadd.f32 %v59_v1, %v58_v0  ;;  %v60_v3 = vld [vmem:[#allocation2 + $0x10] sm:$0xff]  ;;  %v61_v4 = vld [vmem:[#allocation2 + $0x18] sm:$0xff]  ;;  %170 = vrcp.f32 %v283_v6  ;;  %v119_v37 = vld [vmem:[#allocation5] sm:$0x3]  ;;  %s147_s2 = sshll.u32 %s284_s0, 4  ;;  %s149_s30 = sshll.u32 %s326_s3, 4  ;;  %s148_s2 = int_to_ptr.vmem [resolvable:$true] %s147_s2  ;;  %s150_s30 = int_to_ptr.hbm [resolvable:$true] %s149_s30 }
  0x10   :  { %v65_v5 = vadd.f32 %v61_v4, %v60_v3  ;;  %v129_v42 = vld [vmem:[#allocation7] sm:$0x3]  ;;  %v121_v43 = vperm.slane %v119_v37, 0  ;;  %v122_v44 = vperm.slane %v119_v37, 1 }
  0x11   :  { %63 = vadd.xlane.f32.xlu0 %v62_v2  ;;  %v131_v49 = vperm.slane %v129_v42, 0  ;;  %v132_v50 = vperm.slane %v129_v42, 1 }
  0x15   :  { %v171_v7 = vpop.eup %170 }
  0x16   :  { %v69_v8 = vmul.f32 256.0, %v171_v7  ;;  %vm73_vm0 = vweird.f32 %v171_v7 }
  0x18   :  { %v70_v9 = vsub.f32 1.0, %v69_v8 }
  0x19   :  { %66 = vadd.xlane.f32.xlu0 %v65_v5 }
  0x1a   :  { %v71_v10 = vmul.f32 %v171_v7, %v70_v9 }
  0x1c   :  { %v72_v11 = vadd.f32 %v171_v7, %v71_v10 }
  0x1e   :  { %v74_v12 = vsel %vm73_vm0, %v171_v7, %v72_v11 }
  0x84   :  { %v64_v13 = vpop.xlane.xlu0 %63 }
  0x85   :  { %v75_v14 = vmul.f32 %v74_v12, %v64_v13 }
  0x87   :  { %v77_v15 = vsub.f32 %v58_v0, %v75_v14  ;;  %v78_v16 = vsub.f32 %v59_v1, %v75_v14 }
  0x89   :  { %v81_v17 = vmul.f32 %v77_v15, %v77_v15  ;;  %v82_v18 = vmul.f32 %v78_v16, %v78_v16 }
  0x8b   :  { %v85_v19 = vadd.f32 %v82_v18, %v81_v17 }
  0x8c   :  { %v67_v20 = vpop.xlane.xlu0 %66 }
  0x8d   :  { %v76_v21 = vmul.f32 %v74_v12, %v67_v20  ;;  %86 = vadd.xlane.f32.xlu1 %v85_v19 }
  0x8f   :  { %v79_v22 = vsub.f32 %v60_v3, %v76_v21  ;;  %v80_v23 = vsub.f32 %v61_v4, %v76_v21 }
  0x91   :  { %v83_v24 = vmul.f32 %v79_v22, %v79_v22  ;;  %v84_v25 = vmul.f32 %v80_v23, %v80_v23 }
  0x93   :  { %v88_v26 = vadd.f32 %v84_v25, %v83_v24 }
  0x95   :  { %89 = vadd.xlane.f32.xlu1 %v88_v26 }
 0x100   :  { %v87_v27 = vpop.xlane.xlu1 %86 }
 0x101   :  { %v91_v28 = vmul.f32 %v87_v27, %v74_v12 }
 0x103   :  { %v93_v29 = vadd.f32 1e-12, %v91_v28 }
 0x105   :  { %172 = vrsqrt.f32 %v93_v29  ;;  %vm101_vm2 = vweird.f32 %v93_v29 }
 0x108   :  { %v90_v30 = vpop.xlane.xlu1 %89 }
 0x109   :  { %v92_v31 = vmul.f32 %v90_v30, %v74_v12 }
 0x10b   :  { %v173_v32 = vpop.eup %172  ;;  %v94_v33 = vadd.f32 1e-12, %v92_v31 }
 0x10c   :  { %v96_v34 = vmul.f32 %v173_v32, %v93_v29  ;;  %vm102_vm1 = vweird.f32 %v173_v32 }
 0x10d   :  { %174 = vrsqrt.f32 %v94_v33  ;;  %vm103_vm3 = vmor %vm101_vm2, %vm102_vm1  ;;  %vm111_vm5 = vweird.f32 %v94_v33 }
 0x10e   :  { %v97_v35 = vmul.f32 %v173_v32, %v96_v34 }
 0x110   :  { %v98_v36 = vmul.f32 0.5, %v97_v35 }
 0x112   :  { %v99_v38 = vsub.f32 1.5, %v98_v36 }
 0x113   :  { %v175_v39 = vpop.eup %174 }
 0x114   :  { %v100_v40 = vmul.f32 %v173_v32, %v99_v38  ;;  %v106_v41 = vmul.f32 %v175_v39, %v94_v33  ;;  %vm112_vm4 = vweird.f32 %v175_v39 }
 0x115   :  { %vm113_vm6 = vmor %vm111_vm5, %vm112_vm4 }
 0x116   :  { %v104_v45 = vsel %vm103_vm3, %v173_v32, %v100_v40  ;;  %v107_v46 = vmul.f32 %v175_v39, %v106_v41 }
 0x117   :  { %v115_v47 = vmul.f32 %v104_v45, %v77_v15  ;;  %v116_v48 = vmul.f32 %v104_v45, %v78_v16 }
 0x118   :  { %v108_v51 = vmul.f32 0.5, %v107_v46 }
 0x119   :  { %v125_v52 = vmul.f32 %v121_v43, %v115_v47  ;;  %v126_v53 = vmul.f32 %v122_v44, %v116_v48 }
 0x11a   :  { %v109_v54 = vsub.f32 1.5, %v108_v51 }
 0x11b   :  { %v135_v55 = vadd.f32 %v131_v49, %v125_v52  ;;  %v136_v56 = vadd.f32 %v132_v50, %v126_v53 }
 0x11c   :  { %v110_v57 = vmul.f32 %v175_v39, %v109_v54 }
 0x11d   :  { %139 = vst [vmem:[#allocation8] sm:$0xff] %v135_v55 }
 0x11e   :  { %v114_v58 = vsel %vm113_vm6, %v175_v39, %v110_v57  ;;  %140 = vst [vmem:[#allocation8 + $0x8] sm:$0xff] %v136_v56 }
 0x11f   :  { %v117_v59 = vmul.f32 %v114_v58, %v79_v22  ;;  %v118_v60 = vmul.f32 %v114_v58, %v80_v23 }
 0x121   :  { %v127_v61 = vmul.f32 %v121_v43, %v117_v59  ;;  %v128_v62 = vmul.f32 %v122_v44, %v118_v60 }
 0x123   :  { %v137_v63 = vadd.f32 %v131_v49, %v127_v61  ;;  %v138_v0 = vadd.f32 %v132_v50, %v128_v62 }
 0x125   :  { %141 = vst [vmem:[#allocation8 + $0x10] sm:$0xff] %v137_v63 }
 0x126   :  { %142 = vst [vmem:[#allocation8 + $0x18] sm:$0xff] %v138_v0 }
 0x127   :  { %155 = dma.vmem_to_hbm [thread:$0]  %s148_s2, 512, %s150_s30, [#allocation4], %s280_s22, %s280_s22, %s281_s23  }
 0x128   :  { %276 = dma.done.wait [#allocation4], 512  }
 0x129   :  { %277 = vsyncadd [#allocation4], 4294966784 }
 0x12a   :  { %160 = vsyncpa [#allocation3], 1 }
 0x12b   :  { %161 = vsyncpa [#allocation6], 1 }
 0x12c   :  { %162 = vsyncpa [#allocation4], 1 }

</bundles_post_ra>
